<compile_context>
chip_gen: v7x
topology: tpu7x:2x2x1
jax: 0.10.0
libtpu: 0.0.40
codegen_flags: <defaults>
</compile_context>

<pallas_src>
import jax
import jax.numpy as jnp
from jax.experimental import pallas as pl
from jax.experimental.pallas import tpu as pltpu

EPS = 1e-5


def bn_relu_kernel(x_ref, gamma_ref, beta_ref, o_ref):
    # x_ref: (c_tile, L)   gamma/beta: (c_tile, 1)   o_ref: (c_tile, L)
    x = x_ref[...].astype(jnp.float32)
    L = x.shape[-1]
    inv_l = 1.0 / L

    # Fused statistics sweep: sum and sum(x*x) over the lane axis.
    s = jnp.sum(x, axis=-1, keepdims=True)
    sq = jnp.sum(x * x, axis=-1, keepdims=True)
    mean = s * inv_l
    # Biased variance (what BN uses for normalization); clamp >= 0 to guard
    # against cancellation in the E[x^2] - mean^2 form.
    var = jnp.maximum(sq * inv_l - mean * mean, 0.0)
    inv = jax.lax.rsqrt(var + EPS)                     # EUP, ~free

    # Per-channel scale/shift only (c_tile, 1) stays live -> single FMA sweep.
    scale = inv * gamma_ref[...]
    shift = beta_ref[...] - mean * scale
    o_ref[...] = jnp.maximum(x * scale + shift, 0.0).astype(o_ref.dtype)


def _default_num_blocks(C):
    # 3-4 pipelined blocks is the sweet spot on all generations (overlaps one
    # DMA direction against ~0.35us/step grid overhead); on v7x, 4 blocks
    # keeps 2 blocks per TensorCore under "parallel" megacore sharding.
    for nb in (4, 3, 2):
        if C % nb == 0 and (C // nb) % 8 == 0:
            return nb
    return 1


def batchnorm_relu(x_nchw, gamma, beta, *, num_blocks=None):
    N, C, H, W = x_nchw.shape
    L = N * H * W

    if N == 1:
        # Contiguous view: no HBM transpose / copy.
        x_cl = x_nchw.reshape(C, L)
    else:
        # TODO(synk): for N > 1 add an L-tiled, partial-sum kernel path that
        # reads NCHW directly and accumulates sum/sumsq across an "arbitrary"
        # grid axis; the transpose below materializes in HBM.
        x_cl = jnp.transpose(x_nchw, (1, 0, 2, 3)).reshape(C, L)

    gamma2 = gamma.reshape(C, 1).astype(jnp.float32)
    beta2 = beta.reshape(C, 1).astype(jnp.float32)

    if num_blocks is None:
        num_blocks = _default_num_blocks(C)
    assert C % num_blocks == 0
    c_tile = C // num_blocks
    assert c_tile == C or c_tile % 8 == 0, "channel tile must be sublane-aligned"

    itemsize = jnp.dtype(x_cl.dtype).itemsize
    cost = pl.CostEstimate(
        flops=6 * C * L,                         # stats + FMA + relu
        transcendentals=C,                       # one rsqrt per channel
        bytes_accessed=2 * C * L * itemsize + 2 * C * 4,
    )

    out_cl = pl.pallas_call(
        bn_relu_kernel,
        out_shape=jax.ShapeDtypeStruct((C, L), x_cl.dtype),
        grid_spec=pl.GridSpec(
            grid=(num_blocks,),
            in_specs=[
                pl.BlockSpec((c_tile, L), lambda i: (i, 0)),
                pl.BlockSpec((c_tile, 1), lambda i: (i, 0)),
                pl.BlockSpec((c_tile, 1), lambda i: (i, 0)),
            ],
            out_specs=pl.BlockSpec((c_tile, L), lambda i: (i, 0)),
        ),
        compiler_params=pltpu.CompilerParams(
            dimension_semantics=("parallel",)),
        cost_estimate=cost,
    )(x_cl, gamma2, beta2)

    if N == 1:
        return out_cl.reshape(N, C, H, W)
    return jnp.transpose(out_cl.reshape(C, N, H, W), (1, 0, 2, 3))


def reference(x_nchw, gamma, beta):
    # Pure-JAX reference for training-mode BatchNorm2d + ReLU.
    mean = jnp.mean(x_nchw, axis=(0, 2, 3), keepdims=True)
    var = jnp.var(x_nchw, axis=(0, 2, 3), keepdims=True)  # biased
    y = (x_nchw - mean) / jnp.sqrt(var + EPS)
    y = y * gamma.reshape(1, -1, 1, 1) + beta.reshape(1, -1, 1, 1)
    return jnp.maximum(y, 0.0)


if __name__ == "__main__":
    key = jax.random.PRNGKey(0)
    N, C, H, W = 1, 512, 14, 14               # shape implied by the module
    x = jax.random.normal(key, (N, C, H, W), dtype=jnp.float32)

    # PyTorch BatchNorm2d default init: weight=1, bias=0 (deterministic).
    gamma = jnp.ones((C,), dtype=jnp.float32)
    beta = jnp.zeros((C,), dtype=jnp.float32)

    out = batchnorm_relu(x, gamma, beta)
    out = jax.block_until_ready(out)

    ref = reference(x, gamma, beta)
    assert out.shape == (N, C, H, W)
    assert jnp.allclose(out, ref, atol=1e-4, rtol=1e-4)
    print("KERNEL_OK")
</pallas_src>

<mosaic_0001>
module attributes {stable_mosaic.version = 11 : i64} {
  func.func @bn_relu_kernel(%arg0: i32, %arg1: memref<128x196xf32, #tpu.memory_space<vmem>>, %arg2: memref<128x1xf32, #tpu.memory_space<vmem>>, %arg3: memref<128x1xf32, #tpu.memory_space<vmem>>, %arg4: memref<128x196xf32, #tpu.memory_space<vmem>>) attributes {dimension_semantics = [#tpu.dimension_semantics<parallel>], iteration_bounds = array<i64: 4>, scalar_prefetch = 0 : i64, scratch_operands = 0 : i64, tpu.core_type = #tpu.core_type<tc>, window_params = [{transform_indices = @transform_0, window_bounds = array<i64: 128, 196>}, {transform_indices = @transform_1, window_bounds = array<i64: 128, 1>}, {transform_indices = @transform_2, window_bounds = array<i64: 128, 1>}, {transform_indices = @transform_3, window_bounds = array<i64: 128, 196>}]} {
    %c0 = arith.constant 0 : index
    %c0_0 = arith.constant 0 : index
    %0 = vector.load %arg1[%c0, %c0_0] : memref<128x196xf32, #tpu.memory_space<vmem>>, vector<128x196xf32>
    %cst = arith.constant dense<0.000000e+00> : vector<128xf32>
    %1 = vector.multi_reduction <add>, %0, %cst [1] : vector<128x196xf32> to vector<128xf32>
    %2 = vector.shape_cast %1 : vector<128xf32> to vector<128x1xf32>
    %3 = arith.mulf %0, %0 : vector<128x196xf32>
    %cst_1 = arith.constant dense<0.000000e+00> : vector<128xf32>
    %4 = vector.multi_reduction <add>, %3, %cst_1 [1] : vector<128x196xf32> to vector<128xf32>
    %5 = vector.shape_cast %4 : vector<128xf32> to vector<128x1xf32>
    %cst_2 = arith.constant 0.00510204071 : f32
    %6 = vector.broadcast %cst_2 : f32 to vector<128x1xf32>
    %7 = arith.mulf %2, %6 : vector<128x1xf32>
    %cst_3 = arith.constant 0.00510204071 : f32
    %8 = vector.broadcast %cst_3 : f32 to vector<128x1xf32>
    %9 = arith.mulf %5, %8 : vector<128x1xf32>
    %10 = arith.mulf %7, %7 : vector<128x1xf32>
    %11 = arith.subf %9, %10 : vector<128x1xf32>
    %cst_4 = arith.constant 0.000000e+00 : f32
    %12 = vector.broadcast %cst_4 : f32 to vector<128x1xf32>
    %13 = arith.maximumf %11, %12 : vector<128x1xf32>
    %cst_5 = arith.constant 9.99999974E-6 : f32
    %14 = vector.broadcast %cst_5 : f32 to vector<128x1xf32>
    %15 = arith.addf %13, %14 : vector<128x1xf32>
    %16 = math.rsqrt %15 : vector<128x1xf32>
    %c0_6 = arith.constant 0 : index
    %c0_7 = arith.constant 0 : index
    %17 = vector.load %arg2[%c0_6, %c0_7] : memref<128x1xf32, #tpu.memory_space<vmem>>, vector<128x1xf32>
    %18 = arith.mulf %16, %17 : vector<128x1xf32>
    %c0_8 = arith.constant 0 : index
    %c0_9 = arith.constant 0 : index
    %19 = vector.load %arg3[%c0_8, %c0_9] : memref<128x1xf32, #tpu.memory_space<vmem>>, vector<128x1xf32>
    %20 = arith.mulf %7, %18 : vector<128x1xf32>
    %21 = arith.subf %19, %20 : vector<128x1xf32>
    %22 = vector.broadcast %18 : vector<128x1xf32> to vector<128x196xf32>
    %23 = arith.mulf %0, %22 : vector<128x196xf32>
    %24 = vector.broadcast %21 : vector<128x1xf32> to vector<128x196xf32>
    %25 = arith.addf %23, %24 : vector<128x196xf32>
    %cst_10 = arith.constant 0.000000e+00 : f32
    %26 = vector.broadcast %cst_10 : f32 to vector<128x196xf32>
    %27 = arith.maximumf %25, %26 : vector<128x196xf32>
    %c0_11 = arith.constant 0 : index
    %c0_12 = arith.constant 0 : index
    %28 = vector.load %arg4[%c0_11, %c0_12] : memref<128x196xf32, #tpu.memory_space<vmem>>, vector<128x196xf32>
    tpu.vector_store %arg4[%c0_11, %c0_12], %27 {strides = array<i32>} : memref<128x196xf32, #tpu.memory_space<vmem>>, vector<128x196xf32>,
    return
  }
  func.func @transform_0(%arg0: i32) -> (i32, i32) {
    %c0_i32 = arith.constant 0 : i32
    %c0_i32_0 = arith.constant 0 : i32
    return %arg0, %c0_i32 : i32, i32
  }
  func.func @transform_1(%arg0: i32) -> (i32, i32) {
    %c0_i32 = arith.constant 0 : i32
    %c0_i32_0 = arith.constant 0 : i32
    return %arg0, %c0_i32 : i32, i32
  }
  func.func @transform_2(%arg0: i32) -> (i32, i32) {
    %c0_i32 = arith.constant 0 : i32
    %c0_i32_0 = arith.constant 0 : i32
    return %arg0, %c0_i32 : i32, i32
  }
  func.func @transform_3(%arg0: i32) -> (i32, i32) {
    %c0_i32 = arith.constant 0 : i32
    %c0_i32_0 = arith.constant 0 : i32
    return %arg0, %c0_i32 : i32, i32
  }
}

</mosaic_0001>

<bundles_post_ra>
// kernel: tpu_custom_call.1
= control target key start
LH: loop header
LB: loop body
LE: loop exit
PB: predicated region body
PF: predicated region fallthrough
CT: control target
= control target key end

     0   :  { %s1076_s12 = smov 0   ;;  %s1617_s0 = inlined_call_operand.vmem [shape: f32[512,196], index: 0, kind: input, shape index: {}]   ;;  %s1618_s1 = inlined_call_operand.vmem [shape: f32[512,1], index: 1, kind: input, shape index: {}]   ;;  %s1619_s2 = inlined_call_operand.vmem [shape: f32[512,1], index: 2, kind: input, shape index: {}]   ;;  %s1620_s3 = inlined_call_operand.vmem [shape: f32[512,196], index: 3, kind: output, shape index: {}]  }
   0x1 LB: > { %s978_s13 = sadd.s32 4294967295, %s1053_s12   ;;  %p982_p0 = scmp.ge.s32.totalorder %s1053_s12, 1  ;;  %s1053_s12 = sphi %s1076_s12, %s13_s12  }
   0x2   : > { %p161_p1 = scmp.lt.s32.totalorder %s1053_s12, 5 }
   0x4   : > { %p162_p2 = pnand %p982_p0, %p161_p1 }
   0x6   : > { %165 = sbr.rel (%p162_p2) target bundleno = 424 (0x1a8), region = 32 }
   0xd   : > { %s983_s14 = sshll.u32 %s978_s13, 4  ;;  %vm255_vm0 = vcmask 556032  }
   0xe   : > { %p198_p3 = scmp.lt.s32.totalorder %s983_s14, 63 }
  0x10   : > { %s1634_s14 = smov (!%p198_p3, %s983_s14), 63 }
  0x11   : > { %s995_s15 = sshll.u32 %s1634_s14, 4  ;;  %s987_s19 = sshll.u32 %s1634_s14, 3 }
  0x12   : > { %s1092_s18 = scalar_lea.vmem %s1617_s0, %s995_s15  ;;  %s1368_s22 = scalar_lea.vmem %s1618_s1, %s987_s19 }
  0x13   : > { %v1095_v0 = vld [vmem:[%s1092_s18 + $0x20] sm:$0xff]  ;;  %v1098_v1 = vld [vmem:[%s1092_s18 + $0x28] sm:$0xff]  ;;  %v1109_v5 = vld [vmem:[%s1092_s18 + $0x30] sm:$0xff]  ;;  %s1447_s25 = scalar_lea.vmem %s1619_s2, %s987_s19  ;;  %s1512_s28 = scalar_lea.vmem %s1620_s3, %s995_s15 }
  0x14   : > { %v1101_v2 = vld [vmem:[%s1092_s18] sm:$0xff]  ;;  %v264_v3 = vsel %vm255_vm0, %v1098_v1, 0.0  ;;  %v1106_v4 = vld [vmem:[%s1092_s18 + $0x8] sm:$0xff]  ;;  %v1112_v6 = vld [vmem:[%s1092_s18 + $0x38] sm:$0xff] }
  0x15   : > { %v265_v7 = vadd.f32 %v264_v3, %v1095_v0  ;;  %v256_v8 = vsel %vm255_vm0, %v1106_v4, 0.0  ;;  %v268_v9 = vsel %vm255_vm0, %v1112_v6, 0.0  ;;  %v1120_v10 = vld [vmem:[%s1092_s18 + $0x10] sm:$0xff]  ;;  %v1123_v11 = vld [vmem:[%s1092_s18 + $0x18] sm:$0xff]  ;;  %v1132_v15 = vld [vmem:[%s1092_s18 + $0x48] sm:$0xff]  ;;  %v321_v63 = vmul.f32 %v1106_v4, %v1106_v4 }
  0x16   : > { %v257_v12 = vadd.f32 %v256_v8, %v1101_v2  ;;  %v260_v13 = vsel %vm255_vm0, %v1123_v11, 0.0  ;;  %v1129_v14 = vld [vmem:[%s1092_s18 + $0x58] sm:$0xff]  ;;  %v269_v16 = vadd.f32 %v268_v9, %v1109_v5  ;;  %v1137_v18 = vld [vmem:[%s1092_s18 + $0x50] sm:$0xff]  ;;  %v1142_v20 = vld [vmem:[%s1092_s18 + $0x40] sm:$0xff]  ;;  %v272_v21 = vsel %vm255_vm0, %v1132_v15, 0.0 }
  0x17   : > { %266 = vadd.xlane.f32.xlu1 %v265_v7  ;;  %v261_v17 = vadd.f32 %v260_v13, %v1120_v10  ;;  %v276_v19 = vsel %vm255_vm0, %v1129_v14, 0.0  ;;  %v1147_v22 = vld [vmem:[%s1092_s18 + $0x78] sm:$0xff]  ;;  %v1150_v23 = vld [vmem:[%s1092_s18 + $0x68] sm:$0xff]  ;;  %v273_v25 = vadd.f32 %v272_v21, %v1142_v20  ;;  %v1155_v26 = vld [vmem:[%s1092_s18 + $0x70] sm:$0xff]  ;;  %v323_v60 = vmul.f32 %v1123_v11, %v1123_v11 }
  0x18   : > { %258 = vadd.xlane.f32.xlu0 %v257_v12  ;;  %1625 = vst [vmem:[#allocation2_spill] sm:$0xff] %v1150_v23  ;;  %v277_v24 = vadd.f32 %v276_v19, %v1137_v18  ;;  %v284_v27 = vsel %vm255_vm0, %v1147_v22, 0.0  ;;  %v1160_v28 = vld [vmem:[%s1092_s18 + $0x60] sm:$0xff]  ;;  %v280_v29 = vsel %vm255_vm0, %v1150_v23, 0.0  ;;  %v1165_v30 = vld [vmem:[%s1092_s18 + $0x98] sm:$0xff]  ;;  %v1168_v31 = vld [vmem:[%s1092_s18 + $0x88] sm:$0xff]  ;;  %v322_v7 = vmul.f32 %v1120_v10, %v1120_v10 }
  0x19   : > { %v285_v32 = vadd.f32 %v284_v27, %v1155_v26  ;;  %v281_v33 = vadd.f32 %v280_v29, %v1160_v28  ;;  %v1173_v34 = vld [vmem:[%s1092_s18 + $0x90] sm:$0xff]  ;;  %v292_v35 = vsel %vm255_vm0, %v1165_v30, 0.0  ;;  %v1178_v36 = vld [vmem:[%s1092_s18 + $0x80] sm:$0xff]  ;;  %v288_v37 = vsel %vm255_vm0, %v1168_v31, 0.0  ;;  %v1183_v38 = vld [vmem:[%s1092_s18 + $0xb8] sm:$0xff] }
  0x1a   : > { %1626 = vst [vmem:[#allocation3_spill] sm:$0xff] %v1178_v36  ;;  %v1186_v39 = vld [vmem:[%s1092_s18 + $0xa8] sm:$0xff]  ;;  %v293_v40 = vadd.f32 %v292_v35, %v1173_v34  ;;  %v289_v41 = vadd.f32 %v288_v37, %v1178_v36  ;;  %v1191_v42 = vld [vmem:[%s1092_s18 + $0xb0] sm:$0xff]  ;;  %v300_v43 = vsel %vm255_vm0, %v1183_v38, 0.0  ;;  %v1196_v44 = vld [vmem:[%s1092_s18 + $0xa0] sm:$0xff]  ;;  %v356_v9 = vsel %vm255_vm0, %v323_v60, 0.0 }
  0x1b   : > { %270 = vadd.xlane.f32.xlu1 %v269_v16  ;;  %v296_v45 = vsel %vm255_vm0, %v1186_v39, 0.0  ;;  %v1201_v46 = vld [vmem:[%s1092_s18 + $0xd8] sm:$0xff]  ;;  %v1204_v47 = vld [vmem:[%s1092_s18 + $0xc8] sm:$0xff]  ;;  %v301_v48 = vadd.f32 %v300_v43, %v1191_v42  ;;  %v1209_v50 = vld [vmem:[%s1092_s18 + $0xd0] sm:$0xff]  ;;  %v320_v12 = vmul.f32 %v1101_v2, %v1101_v2  ;;  %v327_v13 = vmul.f32 %v1112_v6, %v1112_v6 }
  0x1c   : > { %262 = vadd.xlane.f32.xlu0 %v261_v17  ;;  %v297_v49 = vadd.f32 %v296_v45, %v1196_v44  ;;  %v308_v51 = vsel %vm255_vm0, %v1201_v46, 0.0  ;;  %v1214_v52 = vld [vmem:[%s1092_s18 + $0xc0] sm:$0xff]  ;;  %v304_v53 = vsel %vm255_vm0, %v1204_v47, 0.0  ;;  %v1219_v54 = vld [vmem:[%s1092_s18 + $0xf8] sm:$0xff]  ;;  %v1222_v55 = vld [vmem:[%s1092_s18 + $0xe8] sm:$0xff]  ;;  %v352_v16 = vsel %vm255_vm0, %v321_v63, 0.0 }
  0x1d   : > { %1627 = vst [vmem:[#allocation4_spill] sm:$0xff] %v1219_v54  ;;  %v309_v56 = vadd.f32 %v308_v51, %v1209_v50  ;;  %v305_v57 = vadd.f32 %v304_v53, %v1214_v52  ;;  %v1227_v58 = vld [vmem:[%s1092_s18 + $0xf0] sm:$0xff]  ;;  %v316_v59 = vsel %vm255_vm0, %v1219_v54, 0.0  ;;  %v1234_v61 = vld [vmem:[%s1092_s18 + $0xe0] sm:$0xff]  ;;  %v312_v62 = vsel %vm255_vm0, %v1222_v55, 0.0 }
  0x1e   : > { %1628 = vst [vmem:[#allocation5_spill] sm:$0xff] %v1227_v58  ;;  %v317_v3 = vadd.f32 %v316_v59, %v1227_v58  ;;  %v313_v8 = vadd.f32 %v312_v62, %v1234_v61  ;;  %v325_v17 = vmul.f32 %v1098_v1, %v1098_v1  ;;  %v357_v19 = vadd.f32 %v356_v9, %v322_v7 }
  0x1f   : > { %278 = vadd.xlane.f32.xlu1 %v277_v24  ;;  %v326_v21 = vmul.f32 %v1109_v5, %v1109_v5  ;;  %v353_v24 = vadd.f32 %v352_v16, %v320_v12  ;;  %v324_v27 = vmul.f32 %v1095_v0, %v1095_v0  ;;  %v331_v29 = vmul.f32 %v1129_v14, %v1129_v14 }
  0x20   : > { %274 = vadd.xlane.f32.xlu0 %v273_v25  ;;  %v364_v25 = vsel %vm255_vm0, %v327_v13, 0.0  ;;  %v330_v37 = vmul.f32 %v1137_v18, %v1137_v18  ;;  %v328_v43 = vmul.f32 %v1142_v20, %v1142_v20  ;;  %v335_v45 = vmul.f32 %v1147_v22, %v1147_v22 }
  0x21   : > { %v365_v35 = vadd.f32 %v364_v25, %v326_v21  ;;  %v334_v53 = vmul.f32 %v1155_v26, %v1155_v26  ;;  %v332_v59 = vmul.f32 %v1160_v28, %v1160_v28  ;;  %v339_v60 = vmul.f32 %v1165_v30, %v1165_v30 }
  0x22   : > { %v337_v63 = vmul.f32 %v1168_v31, %v1168_v31  ;;  %v338_v7 = vmul.f32 %v1173_v34, %v1173_v34  ;;  %v336_v12 = vmul.f32 %v1178_v36, %v1178_v36  ;;  %v343_v13 = vmul.f32 %v1183_v38, %v1183_v38 }
  0x23   : > { %286 = vadd.xlane.f32.xlu1 %v285_v32  ;;  %v360_v32 = vsel %vm255_vm0, %v325_v17, 0.0  ;;  %v388_v9 = vsel %vm255_vm0, %v339_v60, 0.0  ;;  %v341_v31 = vmul.f32 %v1186_v39, %v1186_v39  ;;  %v340_v25 = vmul.f32 %v1196_v44, %v1196_v44 }
  0x24   : > { %282 = vadd.xlane.f32.xlu0 %v281_v33  ;;  %v329_v33 = vmul.f32 %v1132_v15, %v1132_v15  ;;  %v384_v16 = vsel %vm255_vm0, %v337_v63, 0.0  ;;  %v389_v17 = vadd.f32 %v388_v9, %v338_v7  ;;  %v345_v39 = vmul.f32 %v1204_v47, %v1204_v47 }
  0x25   : > { %v385_v21 = vadd.f32 %v384_v16, %v336_v12  ;;  %v344_v44 = vmul.f32 %v1214_v52, %v1214_v52  ;;  %v349_v47 = vmul.f32 %v1222_v55, %v1222_v55  ;;  %v348_v52 = vmul.f32 %v1234_v61, %v1234_v61 }
  0x26   : > { %v1055_v55 = vmov 0  }
  0x27   : > { %294 = vadd.xlane.f32.xlu1 %v293_v40  ;;  %v361_v40 = vadd.f32 %v360_v32, %v324_v27  ;;  %v347_v27 = vmul.f32 %v1201_v46, %v1201_v46  ;;  %1006 = vset.pattern.permute.xlu0 %v1055_v55 }
  0x28   : > { %290 = vadd.xlane.f32.xlu0 %v289_v41  ;;  %v372_v41 = vsel %vm255_vm0, %v331_v29, 0.0  ;;  %v392_v29 = vsel %vm255_vm0, %v341_v31, 0.0  ;;  %1007 = vset.pattern.permute.xlu1 %v1055_v55 }
  0x29   : > { %v373_v51 = vadd.f32 %v372_v41, %v330_v37  ;;  %v404_v37 = vsel %vm255_vm0, %v347_v27, 0.0  ;;  %v400_v41 = vsel %vm255_vm0, %v345_v39, 0.0 }
  0x2b   : > { %302 = vadd.xlane.f32.xlu1 %v301_v48  ;;  %v368_v48 = vsel %vm255_vm0, %v329_v33, 0.0  ;;  %v346_v33 = vmul.f32 %v1209_v50, %v1209_v50 }
  0x2c   : > { %298 = vadd.xlane.f32.xlu0 %v297_v49  ;;  %v333_v49 = vmul.f32 %v1150_v23, %v1150_v23 }
  0x2e   : > { %v376_v62 = vsel %vm255_vm0, %v333_v49, 0.0 }
  0x2f   : > { %310 = vadd.xlane.f32.xlu1 %v309_v56  ;;  %v369_v56 = vadd.f32 %v368_v48, %v328_v43  ;;  %v405_v43 = vadd.f32 %v404_v37, %v346_v33  ;;  %v401_v48 = vadd.f32 %v400_v41, %v344_v44 }
  0x30   : > { %306 = vadd.xlane.f32.xlu0 %v305_v57  ;;  %v380_v57 = vsel %vm255_vm0, %v335_v45, 0.0  ;;  %v350_v45 = vmul.f32 %v1227_v58, %v1227_v58 }
  0x33   : > { %318 = vadd.xlane.f32.xlu1 %v317_v3  ;;  %v381_v3 = vadd.f32 %v380_v57, %v334_v53 }
  0x34   : > { %314 = vadd.xlane.f32.xlu0 %v313_v8  ;;  %v377_v8 = vadd.f32 %v376_v62, %v332_v59 }
  0x37   : > { %358 = vadd.xlane.f32.xlu1 %v357_v19  ;;  %v342_v19 = vmul.f32 %v1191_v42, %v1191_v42 }
  0x38   : > { %354 = vadd.xlane.f32.xlu0 %v353_v24  ;;  %v396_v24 = vsel %vm255_vm0, %v343_v13, 0.0 }
  0x39   : > { %v397_v32 = vadd.f32 %v396_v24, %v342_v19 }
  0x3b   : > { %366 = vadd.xlane.f32.xlu1 %v365_v35  ;;  %v393_v35 = vadd.f32 %v392_v29, %v340_v25 }
  0x3c   : > { %362 = vadd.xlane.f32.xlu0 %v361_v40  ;;  %v351_v40 = vmul.f32 %v1219_v54, %v1219_v54 }
  0x3e   : > { %v412_v49 = vsel %vm255_vm0, %v351_v40, 0.0 }
  0x3f   : > { %374 = vadd.xlane.f32.xlu1 %v373_v51  ;;  %v408_v51 = vsel %vm255_vm0, %v349_v47, 0.0  ;;  %v413_v53 = vadd.f32 %v412_v49, %v350_v45 }
  0x40   : > { %370 = vadd.xlane.f32.xlu0 %v369_v56  ;;  %v409_v56 = vadd.f32 %v408_v51, %v348_v52 }
  0x43   : > { %382 = vadd.xlane.f32.xlu1 %v381_v3 }
  0x44   : > { %378 = vadd.xlane.f32.xlu0 %v377_v8 }
  0x47   : > { %390 = vadd.xlane.f32.xlu1 %v389_v17 }
  0x48   : > { %386 = vadd.xlane.f32.xlu0 %v385_v21 }
  0x4b   : > { %398 = vadd.xlane.f32.xlu1 %v397_v32 }
  0x4c   : > { %394 = vadd.xlane.f32.xlu0 %v393_v35 }
  0x4f   : > { %406 = vadd.xlane.f32.xlu1 %v405_v43 }
  0x50   : > { %402 = vadd.xlane.f32.xlu0 %v401_v48 }
  0x53   : > { %414 = vadd.xlane.f32.xlu1 %v413_v53 }
  0x54   : > { %410 = vadd.xlane.f32.xlu0 %v409_v56 }
  0xa4   : > { %v267_v57 = vpop.xlane.xlu1 %266 }
  0xa5   : > { %v259_v59 = vpop.xlane.xlu0 %258  ;;  %v1338_v33 = vmul.f32 0.0051020407, %v267_v57 }
  0xa6   : > { %v1332_v24 = vmul.f32 0.0051020407, %v259_v59 }
  0xa7   : > { %v450_v51 = vmul.f32 %v1338_v33, %v1338_v33 }
  0xa8   : > { %v271_v60 = vpop.xlane.xlu1 %270  ;;  %v448_v35 = vmul.f32 %v1332_v24, %v1332_v24 }
  0xa9   : > { %v263_v62 = vpop.xlane.xlu0 %262  ;;  %v1334_v27 = vmul.f32 0.0051020407, %v271_v60 }
  0xaa   : > { %v1328_v19 = vmul.f32 0.0051020407, %v263_v62 }
  0xab   : > { %v451_v43 = vmul.f32 %v1334_v27, %v1334_v27 }
  0xac   : > { %v279_v63 = vpop.xlane.xlu1 %278  ;;  %v449_v29 = vmul.f32 %v1328_v19, %v1328_v19 }
  0xad   : > { %v275_v3 = vpop.xlane.xlu0 %274  ;;  %v1342_v40 = vmul.f32 0.0051020407, %v279_v63 }
  0xae   : > { %v1346_v45 = vmul.f32 0.0051020407, %v275_v3 }
  0xaf   : > { %v453_v59 = vmul.f32 %v1342_v40, %v1342_v40 }
  0xb0   : > { %v287_v7 = vpop.xlane.xlu1 %286  ;;  %v452_v3 = vmul.f32 %v1346_v45, %v1346_v45 }
  0xb1   : > { %v283_v8 = vpop.xlane.xlu0 %282 }
  0xb4   : > { %v295_v61 = vpop.xlane.xlu1 %294 }
  0xb5   : > { %v291_v9 = vpop.xlane.xlu0 %290 }
  0xb8   : > { %v1318_v12 = vpop.xlane.xlu1 %302 }
  0xb9   : > { %v1320_v13 = vpop.xlane.xlu0 %298 }
  0xbc   : > { %v1322_v16 = vpop.xlane.xlu1 %310 }
  0xbd   : > { %v1324_v31 = vpop.xlane.xlu0 %306 }
  0xc0   : > { %v1326_v17 = vpop.xlane.xlu1 %318 }
  0xc1   : > { %v1330_v21 = vpop.xlane.xlu0 %314 }
  0xc4   : > { %v359_v25 = vpop.xlane.xlu1 %358 }
  0xc5   : > { %v433_v39 = vmul.f32 0.0051020407, %v359_v25  ;;  %v355_v32 = vpop.xlane.xlu0 %354 }
  0xc6   : > { %v432_v37 = vmul.f32 0.0051020407, %v355_v32  ;;  %v1354_v32 = vmul.f32 0.0051020407, %v283_v8 }
  0xc7   : > { %v465_v44 = vsub.f32 %v433_v39, %v449_v29 }
  0xc8   : > { %v464_v41 = vsub.f32 %v432_v37, %v448_v35  ;;  %v367_v47 = vpop.xlane.xlu1 %366 }
  0xc9   : > { %v481_v48 = vmax.f32 %v465_v44, 0.0  ;;  %v435_v49 = vmul.f32 0.0051020407, %v367_v47  ;;  %v363_v52 = vpop.xlane.xlu0 %362 }
  0xca   : > { %v480_v53 = vmax.f32 %v464_v41, 0.0  ;;  %v434_v56 = vmul.f32 0.0051020407, %v363_v52  ;;  %v1359_v52 = vmul.f32 0.0051020407, %v295_v61 }
  0xcb   : > { %v497_v55 = vadd.f32 1e-05, %v481_v48  ;;  %v467_v57 = vsub.f32 %v435_v49, %v451_v43  ;;  %v1357_v49 = vmul.f32 0.0051020407, %v287_v7 }
  0xcc   : > { %v496_v60 = vadd.f32 1e-05, %v480_v53  ;;  %v466_v62 = vsub.f32 %v434_v56, %v450_v51  ;;  %v375_v63 = vpop.xlane.xlu1 %374  ;;  %v454_v53 = vmul.f32 %v1354_v32, %v1354_v32 }
  0xcd   : > { %1008 = vrsqrt.f32 %v497_v55  ;;  %v483_v25 = vmax.f32 %v467_v57, 0.0  ;;  %v437_v29 = vmul.f32 0.0051020407, %v375_v63  ;;  %v371_v39 = vpop.xlane.xlu0 %370  ;;  %v1370_v55 = vmul.f32 0.0051020407, %v291_v9 }
  0xce   : > { %1010 = vrsqrt.f32 %v496_v60  ;;  %v482_v35 = vmax.f32 %v466_v62, 0.0  ;;  %v436_v37 = vmul.f32 0.0051020407, %v371_v39  ;;  %v457_v62 = vmul.f32 %v1359_v52, %v1359_v52 }
  0xcf   : > { %v469_v44 = vsub.f32 %v437_v29, %v453_v59  ;;  %v499_v41 = vadd.f32 1e-05, %v483_v25  ;;  %v1375_v63 = vmul.f32 0.0051020407, %v1318_v12  ;;  %v529_v29 = vld [vmem:[%s1368_s22 + $0x8] sm:$0xff]  ;;  %v455_v39 = vmul.f32 %v1357_v49, %v1357_v49 }
  0xd0   : > { %v498_v47 = vadd.f32 1e-05, %v482_v35  ;;  %v468_v43 = vsub.f32 %v436_v37, %v452_v3  ;;  %v383_v48 = vpop.xlane.xlu1 %382  ;;  %v1381_v9 = vmul.f32 0.0051020407, %v1322_v16  ;;  %v528_v35 = vld [vmem:[%s1368_s22] sm:$0xff] }
  0xd1   : > { %v379_v51 = vpop.xlane.xlu0 %378  ;;  %v485_v7 = vmax.f32 %v469_v44, 0.0  ;;  %v439_v57 = vmul.f32 0.0051020407, %v383_v48  ;;  %v456_v44 = vmul.f32 %v1370_v55, %v1370_v55  ;;  %v459_v16 = vmul.f32 %v1375_v63, %v1375_v63 }
  0xd2   : > { %1012 = vrsqrt.f32 %v498_v47  ;;  %v484_v8 = vmax.f32 %v468_v43, 0.0  ;;  %v438_v56 = vmul.f32 0.0051020407, %v379_v51 }
  0xd3   : > { %1014 = vrsqrt.f32 %v499_v41  ;;  %v501_v41 = vadd.f32 1e-05, %v485_v7  ;;  %v471_v48 = vsub.f32 %v439_v57, %v455_v39  ;;  %v1393_v7 = vmul.f32 0.0051020407, %v1320_v13 }
  0xd4   : > { %v500_v61 = vadd.f32 1e-05, %v484_v8  ;;  %v470_v59 = vsub.f32 %v438_v56, %v454_v53  ;;  %v391_v60 = vpop.xlane.xlu1 %390  ;;  %v1400_v57 = vmul.f32 0.0051020407, %v1326_v17 }
  0xd5   : > { %v441_v3 = vmul.f32 0.0051020407, %v391_v60  ;;  %v387_v25 = vpop.xlane.xlu0 %386  ;;  %v487_v39 = vmax.f32 %v471_v48, 0.0 }
  0xd6   : > { %v440_v43 = vmul.f32 0.0051020407, %v387_v25  ;;  %1016 = vrsqrt.f32 %v500_v61  ;;  %v486_v51 = vmax.f32 %v470_v59, 0.0  ;;  %v530_v61 = vld [vmem:[%s1368_s22 + $0x10] sm:$0xff] }
  0xd7   : > { %v1009_v37 = vpop.eup %1008  ;;  %v473_v47 = vsub.f32 %v441_v3, %v457_v62  ;;  %v461_v62 = vmul.f32 %v1381_v9, %v1381_v9  ;;  %1018 = vrsqrt.f32 %v501_v41  ;;  %v463_v41 = vmul.f32 %v1400_v57, %v1400_v57 }
  0xd8   : > { %v1011_v12 = vpop.eup %1010  ;;  %v399_v53 = vpop.xlane.xlu1 %398  ;;  %v1386_v8 = vmul.f32 %v1009_v37, %v529_v29  ;;  %v472_v3 = vsub.f32 %v440_v43, %v456_v44  ;;  %v502_v13 = vadd.f32 1e-05, %v486_v51  ;;  %v458_v44 = vmul.f32 %v1393_v7, %v1393_v7 }
  0xd9   : > { %v489_v56 = vmax.f32 %v473_v47, 0.0  ;;  %v443_v60 = vmul.f32 0.0051020407, %v399_v53  ;;  %v395_v36 = vpop.xlane.xlu0 %394  ;;  %v1390_v54 = vmul.f32 %v1011_v12, %v528_v35  ;;  %v1408_v43 = vmul.f32 0.0051020407, %v1324_v31 }
  0xda   : > { %615 = vperm.xlu1 %1007, %v1386_v8   ;;  %v442_v35 = vmul.f32 0.0051020407, %v395_v36  ;;  %v488_v48 = vmax.f32 %v472_v3, 0.0 }
  0xdb   : > { %v505_v59 = vadd.f32 1e-05, %v489_v56  ;;  %v475_v25 = vsub.f32 %v443_v60, %v459_v16  ;;  %610 = vperm.xlu0 %1006, %v1390_v54   ;;  %v531_v16 = vld [vmem:[%s1368_s22 + $0x18] sm:$0xff]  ;;  %v503_v56 = vadd.f32 1e-05, %v487_v39  ;;  %v460_v3 = vmul.f32 %v1408_v43, %v1408_v43  ;;  %v532_v39 = vld [vmem:[%s1368_s22 + $0x20] sm:$0xff] }
  0xdc   : > { %v1013_v29 = vpop.eup %1012  ;;  %v407_v37 = vpop.xlane.xlu1 %406  ;;  %v474_v60 = vsub.f32 %v442_v35, %v458_v44 }
  0xdd   : > { %1020 = vrsqrt.f32 %v505_v59  ;;  %v491_v47 = vmax.f32 %v475_v25, 0.0  ;;  %v445_v12 = vmul.f32 0.0051020407, %v407_v37  ;;  %v403_v53 = vpop.xlane.xlu0 %402  ;;  %v1403_v58 = vmul.f32 %v1013_v29, %v530_v61  ;;  %v1015_v17 = vpop.eup %1014 }
  0xde   : > { %1022 = vrsqrt.f32 %v502_v13  ;;  %v444_v61 = vmul.f32 0.0051020407, %v403_v53  ;;  %v1414_v37 = vmul.f32 %v1015_v17, %v531_v16  ;;  %v504_v13 = vadd.f32 1e-05, %v488_v48  ;;  %v533_v48 = vld [vmem:[%s1368_s22 + $0x28] sm:$0xff] }
  0xdf   : > { %v507_v36 = vadd.f32 1e-05, %v491_v47  ;;  %v477_v51 = vsub.f32 %v445_v12, %v461_v62  ;;  %620 = vperm.xlu1 %1007, %v1403_v58   ;;  %v1419_v62 = vmul.f32 0.0051020407, %v1330_v21  ;;  %v490_v12 = vmax.f32 %v474_v60, 0.0 }
  0xe0   : > { %v415_v59 = vpop.xlane.xlu1 %414  ;;  %v1017_v23 = vpop.eup %1016  ;;  %v476_v53 = vsub.f32 %v444_v61, %v460_v3  ;;  %v534_v3 = vld [vmem:[%s1368_s22 + $0x30] sm:$0xff] }
  0xe1   : > { %1024 = vrsqrt.f32 %v507_v36  ;;  %v493_v25 = vmax.f32 %v477_v51, 0.0  ;;  %v447_v29 = vmul.f32 0.0051020407, %v415_v59  ;;  %v411_v31 = vpop.xlane.xlu0 %410  ;;  %v1423_v16 = vmul.f32 %v1017_v23, %v532_v39  ;;  %v537_v36 = vld [vmem:[%s1368_s22 + $0x48] sm:$0xff]  ;;  %v1019_v51 = vpop.eup %1018 }
  0xe2   : > { %1026 = vrsqrt.f32 %v503_v56  ;;  %v446_v17 = vmul.f32 0.0051020407, %v411_v31  ;;  %v462_v21 = vmul.f32 %v1419_v62, %v1419_v62  ;;  %v506_v56 = vadd.f32 1e-05, %v490_v12 }
  0xe3   : > { %v509_v35 = vadd.f32 1e-05, %v493_v25  ;;  %v479_v47 = vsub.f32 %v447_v29, %v463_v41  ;;  %625 = vperm.xlu1 %1007, %v1414_v37   ;;  %v492_v60 = vmax.f32 %v476_v53, 0.0  ;;  %v549_v23 = vmul.f32 %v1019_v51, %v533_v48  ;;  %v539_v29 = vld [vmem:[%s1368_s22 + $0x58] sm:$0xff]  ;;  %v541_v53 = vld [vmem:[%s1368_s22 + $0x68] sm:$0xff] }
  0xe4   : > { %v478_v61 = vsub.f32 %v446_v17, %v462_v21 }
  0xe5   : > { %1028 = vrsqrt.f32 %v509_v35  ;;  %v495_v44 = vmax.f32 %v479_v47, 0.0 }
  0xe6   : > { %1030 = vrsqrt.f32 %v504_v13  ;;  %v508_v13 = vadd.f32 1e-05, %v492_v60  ;;  %v494_v35 = vmax.f32 %v478_v61, 0.0 }
  0xe7   : > { %v1021_v59 = vpop.eup %1020  ;;  %v511_v41 = vadd.f32 1e-05, %v495_v44  ;;  %630 = vperm.xlu1 %1007, %v1423_v16   ;;  %v535_v44 = vld [vmem:[%s1368_s22 + $0x38] sm:$0xff] }
  0xe8   : > { %v1430_v25 = vmul.f32 %v1021_v59, %v537_v36  ;;  %v1023_v31 = vpop.eup %1022  ;;  %v510_v51 = vadd.f32 1e-05, %v494_v35 }
  0xe9   : > { %1032 = vrsqrt.f32 %v511_v41  ;;  %v1435_v12 = vmul.f32 %v1023_v31, %v534_v3  ;;  %v543_v41 = vld [vmem:[%s1368_s22 + $0x78] sm:$0xff]  ;;  %v561_v3 = vld [vmem:[%s1447_s25 + $0x8] sm:$0xff] }
  0xea   : > { %655 = vperm.xlu0 %1006, %v1430_v25   ;;  %1034 = vrsqrt.f32 %v506_v56  ;;  %v536_v56 = vld [vmem:[%s1368_s22 + $0x40] sm:$0xff] }
  0xeb   : > { %v1025_v39 = vpop.eup %1024  ;;  %635 = vperm.xlu1 %1007, %v549_v23   ;;  %1036 = vrsqrt.f32 %v508_v13  ;;  %v538_v13 = vld [vmem:[%s1368_s22 + $0x50] sm:$0xff] }
  0xec   : > { %v555_v47 = vmul.f32 %v1025_v39, %v539_v29  ;;  %v1027_v17 = vpop.eup %1026  ;;  %1038 = vrsqrt.f32 %v510_v51  ;;  %v577_v29 = vmul.f32 %v1386_v8, %v1328_v19  ;;  %v540_v51 = vld [vmem:[%s1368_s22 + $0x60] sm:$0xff]  ;;  %v581_v8 = vmul.f32 %v549_v23, %v1342_v40 }
  0xed   : > { %v551_v59 = vmul.f32 %v1027_v17, %v535_v44  ;;  %v563_v44 = vld [vmem:[%s1447_s25 + $0x18] sm:$0xff]  ;;  %v585_v23 = vmul.f32 %v1430_v25, %v1359_v52  ;;  %v564_v52 = vld [vmem:[%s1447_s25 + $0x20] sm:$0xff] }
  0xee   : > { %665 = vperm.xlu0 %1006, %v555_v47   ;;  %v593_v35 = vsub.f32 %v561_v3, %v577_v29  ;;  %v567_v3 = vld [vmem:[%s1447_s25 + $0x38] sm:$0xff] }
  0xef   : > { %v1029_v36 = vpop.eup %1028  ;;  %640 = vperm.xlu1 %1007, %v1435_v12  }
  0xf0   : > { %v557_v21 = vmul.f32 %v1029_v36, %v541_v53  ;;  %v1031_v48 = vpop.eup %1030  ;;  %v579_v53 = vmul.f32 %v1414_v37, %v1334_v27  ;;  %v583_v37 = vmul.f32 %v551_v59, %v1357_v49  ;;  %v578_v49 = vmul.f32 %v1403_v58, %v1338_v33 }
  0xf1   : > { %v552_v31 = vmul.f32 %v1031_v48, %v536_v56 }
  0xf2   : > { %675 = vperm.xlu0 %1006, %v557_v21   ;;  %v595_v19 = vsub.f32 %v563_v44, %v579_v53  ;;  %v599_v40 = vsub.f32 %v567_v3, %v583_v37  ;;  %v569_v53 = vld [vmem:[%s1447_s25 + $0x48] sm:$0xff]  ;;  %v589_v58 = vmul.f32 %v557_v21, %v1381_v9  ;;  %v568_v9 = vld [vmem:[%s1447_s25 + $0x40] sm:$0xff] }
  0xf3   : > { %v1033_v60 = vpop.eup %1032  ;;  %645 = vperm.xlu1 %1007, %v551_v59   ;;  %v562_v59 = vld [vmem:[%s1447_s25 + $0x10] sm:$0xff]  ;;  %v601_v44 = vsub.f32 %v569_v53, %v585_v23  ;;  %v572_v3 = vld [vmem:[%s1447_s25 + $0x60] sm:$0xff] }
  0xf4   : > { %v559_v61 = vmul.f32 %v1033_v60, %v543_v41  ;;  %v1035_v39 = vpop.eup %1034  ;;  %v565_v41 = vld [vmem:[%s1447_s25 + $0x28] sm:$0xff]  ;;  %v542_v60 = vld [vmem:[%s1368_s22 + $0x70] sm:$0xff] }
  0xf5   : > { %v554_v17 = vmul.f32 %v1035_v39, %v538_v13  ;;  %v1037_v36 = vpop.eup %1036  ;;  %v597_v27 = vsub.f32 %v565_v41, %v581_v8  ;;  %v576_v39 = vmul.f32 %v1390_v54, %v1332_v24  ;;  %v560_v13 = vld [vmem:[%s1447_s25] sm:$0xff]  ;;  %v587_v54 = vmul.f32 %v555_v47, %v1375_v63  ;;  %v566_v63 = vld [vmem:[%s1447_s25 + $0x30] sm:$0xff]  ;;  %v575_v41 = vld [vmem:[%s1447_s25 + $0x78] sm:$0xff] }
  0xf6   : > { %685 = vperm.xlu0 %1006, %v559_v61   ;;  %v556_v48 = vmul.f32 %v1037_v36, %v540_v51  ;;  %v1039_v56 = vpop.eup %1038  ;;  %v594_v24 = vsub.f32 %v562_v59, %v578_v49  ;;  %v571_v36 = vld [vmem:[%s1447_s25 + $0x58] sm:$0xff]  ;;  %v580_v51 = vmul.f32 %v1423_v16, %v1346_v45  ;;  %v582_v8 = vmul.f32 %v1435_v12, %v1354_v32  ;;  %v570_v12 = vld [vmem:[%s1447_s25 + $0x50] sm:$0xff] }
  0xf7   : > { %650 = vperm.xlu1 %1007, %v552_v31   ;;  %v558_v29 = vmul.f32 %v1039_v56, %v542_v60  ;;  %v603_v25 = vsub.f32 %v571_v36, %v587_v54  ;;  %v591_v45 = vmul.f32 %v559_v61, %v1400_v57  ;;  %v584_v56 = vmul.f32 %v552_v31, %v1370_v55  ;;  %v574_v55 = vld [vmem:[%s1447_s25 + $0x70] sm:$0xff] }
  0xf8   : > { %v596_v33 = vsub.f32 %v564_v52, %v580_v51  ;;  %v598_v16 = vsub.f32 %v566_v63, %v582_v8  ;;  %v586_v32 = vmul.f32 %v554_v17, %v1393_v7  ;;  %v588_v37 = vmul.f32 %v556_v48, %v1408_v43 }
  0xf9   : > { %v607_v21 = vsub.f32 %v575_v41, %v591_v45  ;;  %v600_v60 = vsub.f32 %v568_v9, %v584_v56  ;;  %v590_v61 = vmul.f32 %v558_v29, %v1419_v62 }
  0xfa   : > { %727 = vperm.xlu0 %1006, %v593_v35   ;;  %v592_v35 = vsub.f32 %v560_v13, %v576_v39  ;;  %v604_v57 = vsub.f32 %v572_v3, %v588_v37 }
  0xfb   : > { %660 = vperm.xlu1 %1007, %v554_v17   ;;  %v606_v31 = vsub.f32 %v574_v55, %v590_v61 }
  0xfe   : > { %737 = vperm.xlu0 %1006, %v595_v19   ;;  %v573_v19 = vld [vmem:[%s1447_s25 + $0x68] sm:$0xff] }
  0xff   : > { %670 = vperm.xlu1 %1007, %v556_v48   ;;  %v605_v47 = vsub.f32 %v573_v19, %v589_v58 }
 0x102   : > { %747 = vperm.xlu0 %1006, %v597_v27   ;;  %v602_v27 = vsub.f32 %v570_v12, %v586_v32 }
 0x103   : > { %680 = vperm.xlu1 %1007, %v558_v29  }
 0x106   : > { %757 = vperm.xlu0 %1006, %v599_v40  }
 0x107   : > { %722 = vperm.xlu1 %1007, %v592_v35  }
 0x10a   : > { %767 = vperm.xlu0 %1006, %v601_v44  }
 0x10b   : > { %732 = vperm.xlu1 %1007, %v594_v24  }
 0x10e   : > { %777 = vperm.xlu0 %1006, %v603_v25  }
 0x10f   : > { %742 = vperm.xlu1 %1007, %v596_v33  }
 0x112   : > { %787 = vperm.xlu0 %1006, %v605_v47  }
 0x113   : > { %752 = vperm.xlu1 %1007, %v598_v16  }
 0x116   : > { %797 = vperm.xlu0 %1006, %v607_v21  }
 0x117   : > { %762 = vperm.xlu1 %1007, %v600_v60  }
 0x11b   : > { %772 = vperm.xlu1 %1007, %v602_v27  }
 0x11f   : > { %782 = vperm.xlu1 %1007, %v604_v57  }
 0x123   : > { %792 = vperm.xlu1 %1007, %v606_v31  }
 0x159   : > { %v616_v39 = vpop.permute.xlu1 %615 }
 0x15a   : > { %v611_v23 = vpop.permute.xlu0 %610  ;;  %v690_v59 = vmul.f32 %v616_v39, %v1120_v10  ;;  %v691_v44 = vmul.f32 %v616_v39, %v1123_v11 }
 0x15b   : > { %v689_v32 = vmul.f32 %v611_v23, %v1106_v4 }
 0x15e   : > { %v621_v13 = vpop.permute.xlu1 %620 }
 0x15f   : > { %v692_v4 = vmul.f32 %v621_v13, %v1095_v0  ;;  %v693_v31 = vmul.f32 %v621_v13, %v1098_v1 }
 0x162   : > { %v626_v40 = vpop.permute.xlu1 %625 }
 0x163   : > { %v694_v52 = vmul.f32 %v626_v40, %v1109_v5  ;;  %v695_v10 = vmul.f32 %v626_v40, %v1112_v6 }
 0x166   : > { %v1491_v7 = vpop.permute.xlu1 %630 }
 0x169   : > { %v656_v17 = vpop.permute.xlu0 %655 }
 0x16a   : > { %v636_v35 = vpop.permute.xlu1 %635  ;;  %v707_v61 = vmul.f32 %v656_v17, %v1165_v30 }
 0x16b   : > { %v698_v63 = vmul.f32 %v636_v35, %v1137_v18  ;;  %v699_v47 = vmul.f32 %v636_v35, %v1129_v14  ;;  %v688_v14 = vmul.f32 %v611_v23, %v1101_v2 }
 0x16d   : > { %v1493_v53 = vpop.permute.xlu0 %665 }
 0x16e   : > { %v1495_v43 = vpop.permute.xlu1 %640  ;;  %v710_v0 = vmul.f32 %v1493_v53, %v1191_v42  ;;  %v711_v1 = vmul.f32 %v1493_v53, %v1183_v38 }
 0x171   : > { %v1497_v48 = vpop.permute.xlu0 %675 }
 0x172   : > { %v646_v62 = vpop.permute.xlu1 %645 }
 0x173   : > { %v702_v9 = vmul.f32 %v646_v62, %v1155_v26  ;;  %v703_v21 = vmul.f32 %v646_v62, %v1147_v22  ;;  %v706_v22 = vmul.f32 %v656_v17, %v1173_v34 }
 0x175   : > { %v1499_v29 = vpop.permute.xlu0 %685 }
 0x176   : > { %v1501_v49 = vpop.permute.xlu1 %650 }
 0x179   : > { %v728_v54 = vpop.permute.xlu0 %727 }
 0x17a   : > { %v1505_v24 = vpop.permute.xlu1 %660  ;;  %v802_v36 = vadd.f32 %v728_v54, %v690_v59  ;;  %v803_v51 = vadd.f32 %v728_v54, %v691_v44  ;;  %v696_v44 = vmul.f32 %v1491_v7, %v1142_v20  ;;  %v697_v54 = vmul.f32 %v1491_v7, %v1132_v15 }
 0x17b   : > { %v714_v15 = vmul.f32 %v1497_v48, %v1209_v50  ;;  %v715_v7 = vmul.f32 %v1497_v48, %v1201_v46  ;;  %v1630_v48 = vld [vmem:[#allocation5_spill] sm:$0xff] }
 0x17c   : > { %v834_v11 = vmax.f32 %v802_v36, 0.0  ;;  %v835_v25 = vmax.f32 %v803_v51, 0.0 }
 0x17d   : > { %v738_v58 = vpop.permute.xlu0 %737 }
 0x17e   : > { %866 = vst [vmem:[%s1512_s28 + $0x10] sm:$0xff] %v834_v11  ;;  %867 = vst.msk [vmem:[%s1512_s28 + $0x18] sm:$0xff] %vm255_vm0, %v835_v25  ;;  %v1519_v33 = vpop.permute.xlu1 %670  ;;  %v806_v19 = vadd.f32 %v738_v58, %v694_v52  ;;  %v807_v8 = vadd.f32 %v738_v58, %v695_v10  ;;  %v700_v58 = vmul.f32 %v1495_v43, %v1160_v28 }
 0x180   : > { %v838_v45 = vmax.f32 %v806_v19, 0.0  ;;  %v839_v5 = vmax.f32 %v807_v8, 0.0  ;;  %v1629_v19 = vld [vmem:[#allocation2_spill] sm:$0xff] }
 0x181   : > { %v748_v16 = vpop.permute.xlu0 %747  ;;  %v701_v8 = vmul.f32 %v1495_v43, %v1629_v19  ;;  %v718_v43 = vmul.f32 %v1499_v29, %v1630_v48 }
 0x182   : > { %870 = vst [vmem:[%s1512_s28 + $0x30] sm:$0xff] %v838_v45  ;;  %871 = vst.msk [vmem:[%s1512_s28 + $0x38] sm:$0xff] %vm255_vm0, %v839_v5  ;;  %v1526_v6 = vpop.permute.xlu1 %680  ;;  %v810_v41 = vadd.f32 %v748_v16, %v698_v63  ;;  %v811_v56 = vadd.f32 %v748_v16, %v699_v47 }
 0x184   : > { %v842_v60 = vmax.f32 %v810_v41, 0.0  ;;  %v843_v18 = vmax.f32 %v811_v56, 0.0  ;;  %v1631_v41 = vld [vmem:[#allocation4_spill] sm:$0xff] }
 0x185   : > { %v758_v12 = vpop.permute.xlu0 %757  ;;  %v719_v56 = vmul.f32 %v1499_v29, %v1631_v41 }
 0x186   : > { %874 = vst [vmem:[%s1512_s28 + $0x50] sm:$0xff] %v842_v60  ;;  %875 = vst.msk [vmem:[%s1512_s28 + $0x58] sm:$0xff] %vm255_vm0, %v843_v18  ;;  %v723_v27 = vpop.permute.xlu1 %722  ;;  %v814_v37 = vadd.f32 %v758_v12, %v702_v9  ;;  %v815_v3 = vadd.f32 %v758_v12, %v703_v21  ;;  %v1632_v60 = vld [vmem:[#allocation3_spill] sm:$0xff] }
 0x187   : > { %v800_v57 = vadd.f32 %v723_v27, %v688_v14  ;;  %v801_v26 = vadd.f32 %v723_v27, %v689_v32  ;;  %v704_v18 = vmul.f32 %v1501_v49, %v1632_v60  ;;  %v1040_v14 = vld [vmem:[%s1092_s18 + $0x88] sm:$0xff] }
 0x188   : > { %v846_v2 = vmax.f32 %v814_v37, 0.0  ;;  %v847_v55 = vmax.f32 %v815_v3, 0.0  ;;  %v705_v32 = vmul.f32 %v1040_v14, %v1501_v49 }
 0x189   : > { %v832_v39 = vmax.f32 %v800_v57, 0.0  ;;  %v833_v40 = vmax.f32 %v801_v26, 0.0  ;;  %v768_v23 = vpop.permute.xlu0 %767 }
 0x18a   : > { %878 = vst [vmem:[%s1512_s28 + $0x70] sm:$0xff] %v846_v2  ;;  %879 = vst.msk [vmem:[%s1512_s28 + $0x78] sm:$0xff] %vm255_vm0, %v847_v55  ;;  %v733_v35 = vpop.permute.xlu1 %732  ;;  %v818_v62 = vadd.f32 %v768_v23, %v706_v22  ;;  %v819_v59 = vadd.f32 %v768_v23, %v707_v61  ;;  %v1041_v2 = vld [vmem:[%s1092_s18 + $0xa0] sm:$0xff] }
 0x18b   : > { %864 = vst [vmem:[%s1512_s28] sm:$0xff] %v832_v39  ;;  %865 = vst.msk [vmem:[%s1512_s28 + $0x8] sm:$0xff] %vm255_vm0, %v833_v40  ;;  %v804_v30 = vadd.f32 %v733_v35, %v692_v4  ;;  %v805_v34 = vadd.f32 %v733_v35, %v693_v31  ;;  %v708_v55 = vmul.f32 %v1041_v2, %v1505_v24  ;;  %v1042_v4 = vld [vmem:[%s1092_s18 + $0xa8] sm:$0xff] }
 0x18c   : > { %v850_v13 = vmax.f32 %v818_v62, 0.0  ;;  %v851_v17 = vmax.f32 %v819_v59, 0.0  ;;  %v709_v31 = vmul.f32 %v1042_v4, %v1505_v24  ;;  %v1043_v59 = vld [vmem:[%s1092_s18 + $0xc0] sm:$0xff] }
 0x18d   : > { %v836_v36 = vmax.f32 %v804_v30, 0.0  ;;  %v837_v51 = vmax.f32 %v805_v34, 0.0  ;;  %v778_v52 = vpop.permute.xlu0 %777  ;;  %v712_v30 = vmul.f32 %v1043_v59, %v1519_v33  ;;  %v1044_v34 = vld [vmem:[%s1092_s18 + $0xc8] sm:$0xff] }
 0x18e   : > { %882 = vst [vmem:[%s1512_s28 + $0x90] sm:$0xff] %v850_v13  ;;  %883 = vst.msk [vmem:[%s1512_s28 + $0x98] sm:$0xff] %vm255_vm0, %v851_v17  ;;  %v743_v10 = vpop.permute.xlu1 %742  ;;  %v822_v42 = vadd.f32 %v778_v52, %v710_v0  ;;  %v823_v11 = vadd.f32 %v778_v52, %v711_v1  ;;  %v713_v24 = vmul.f32 %v1044_v34, %v1519_v33 }
 0x18f   : > { %868 = vst [vmem:[%s1512_s28 + $0x20] sm:$0xff] %v836_v36  ;;  %869 = vst.msk [vmem:[%s1512_s28 + $0x28] sm:$0xff] %vm255_vm0, %v837_v51  ;;  %v808_v38 = vadd.f32 %v743_v10, %v696_v44  ;;  %v809_v20 = vadd.f32 %v743_v10, %v697_v54  ;;  %v1045_v54 = vld [vmem:[%s1092_s18 + $0xe0] sm:$0xff]  ;;  %v1046_v51 = vld [vmem:[%s1092_s18 + $0xe8] sm:$0xff] }
 0x190   : > { %v854_v53 = vmax.f32 %v822_v42, 0.0  ;;  %v855_v25 = vmax.f32 %v823_v11, 0.0  ;;  %v716_v36 = vmul.f32 %v1045_v54, %v1526_v6  ;;  %v717_v52 = vmul.f32 %v1046_v51, %v1526_v6 }
 0x191   : > { %v840_v63 = vmax.f32 %v808_v38, 0.0  ;;  %v841_v47 = vmax.f32 %v809_v20, 0.0  ;;  %v788_v45 = vpop.permute.xlu0 %787 }
 0x192   : > { %886 = vst [vmem:[%s1512_s28 + $0xb0] sm:$0xff] %v854_v53  ;;  %887 = vst.msk [vmem:[%s1512_s28 + $0xb8] sm:$0xff] %vm255_vm0, %v855_v25  ;;  %v753_v5 = vpop.permute.xlu1 %752  ;;  %v826_v50 = vadd.f32 %v788_v45, %v714_v15  ;;  %v827_v16 = vadd.f32 %v788_v45, %v715_v7 }
 0x193   : > { %872 = vst [vmem:[%s1512_s28 + $0x40] sm:$0xff] %v840_v63  ;;  %873 = vst.msk [vmem:[%s1512_s28 + $0x48] sm:$0xff] %vm255_vm0, %v841_v47  ;;  %v812_v46 = vadd.f32 %v753_v5, %v700_v58  ;;  %v813_v28 = vadd.f32 %v753_v5, %v701_v8 }
 0x194   : > { %v858_v9 = vmax.f32 %v826_v50, 0.0  ;;  %v859_v21 = vmax.f32 %v827_v16, 0.0 }
 0x195   : > { %v844_v12 = vmax.f32 %v812_v46, 0.0  ;;  %v845_v27 = vmax.f32 %v813_v28, 0.0  ;;  %v798_v37 = vpop.permute.xlu0 %797 }
 0x196   : > { %890 = vst [vmem:[%s1512_s28 + $0xd0] sm:$0xff] %v858_v9  ;;  %891 = vst.msk [vmem:[%s1512_s28 + $0xd8] sm:$0xff] %vm255_vm0, %v859_v21  ;;  %v763_v3 = vpop.permute.xlu1 %762  ;;  %v830_v29 = vadd.f32 %v798_v37, %v718_v43  ;;  %v831_v57 = vadd.f32 %v798_v37, %v719_v56 }
 0x197   : > { %876 = vst [vmem:[%s1512_s28 + $0x60] sm:$0xff] %v844_v12  ;;  %877 = vst.msk [vmem:[%s1512_s28 + $0x68] sm:$0xff] %vm255_vm0, %v845_v27  ;;  %v816_v26 = vadd.f32 %v763_v3, %v704_v18  ;;  %v817_v22 = vadd.f32 %v763_v3, %v705_v32 }
 0x198   : > { %v862_v49 = vmax.f32 %v830_v29, 0.0  ;;  %v863_v61 = vmax.f32 %v831_v57, 0.0 }
 0x199   : > { %v848_v39 = vmax.f32 %v816_v26, 0.0  ;;  %v849_v40 = vmax.f32 %v817_v22, 0.0 }
 0x19a   : > { %894 = vst [vmem:[%s1512_s28 + $0xf0] sm:$0xff] %v862_v49  ;;  %895 = vst.msk [vmem:[%s1512_s28 + $0xf8] sm:$0xff] %vm255_vm0, %v863_v61  ;;  %v773_v23 = vpop.permute.xlu1 %772 }
 0x19b   : > { %880 = vst [vmem:[%s1512_s28 + $0x80] sm:$0xff] %v848_v39  ;;  %881 = vst.msk [vmem:[%s1512_s28 + $0x88] sm:$0xff] %vm255_vm0, %v849_v40  ;;  %v820_v35 = vadd.f32 %v773_v23, %v708_v55  ;;  %v821_v62 = vadd.f32 %v773_v23, %v709_v31 }
 0x19d   : > { %v852_v0 = vmax.f32 %v820_v35, 0.0  ;;  %v853_v1 = vmax.f32 %v821_v62, 0.0 }
 0x19e   : > { %v783_v13 = vpop.permute.xlu1 %782 }
 0x19f   : > { %884 = vst [vmem:[%s1512_s28 + $0xa0] sm:$0xff] %v852_v0  ;;  %885 = vst.msk [vmem:[%s1512_s28 + $0xa8] sm:$0xff] %vm255_vm0, %v853_v1  ;;  %v824_v17 = vadd.f32 %v783_v13, %v712_v30  ;;  %v825_v44 = vadd.f32 %v783_v13, %v713_v24 }
 0x1a1   : > { %v856_v10 = vmax.f32 %v824_v17, 0.0  ;;  %v857_v42 = vmax.f32 %v825_v44, 0.0 }
 0x1a2   : > { %v793_v33 = vpop.permute.xlu1 %792 }
 0x1a3   : > { %888 = vst [vmem:[%s1512_s28 + $0xc0] sm:$0xff] %v856_v10  ;;  %889 = vst.msk [vmem:[%s1512_s28 + $0xc8] sm:$0xff] %vm255_vm0, %v857_v42  ;;  %v828_v11 = vadd.f32 %v793_v33, %v716_v36  ;;  %v829_v38 = vadd.f32 %v793_v33, %v717_v52 }
 0x1a5   : > { %v860_v20 = vmax.f32 %v828_v11, 0.0  ;;  %v861_v15 = vmax.f32 %v829_v38, 0.0 }
 0x1a7   : > { %892 = vst [vmem:[%s1512_s28 + $0xe0] sm:$0xff] %v860_v20  ;;  %893 = vst.msk [vmem:[%s1512_s28 + $0xe8] sm:$0xff] %vm255_vm0, %v861_v15 }
 0x1a8 PF: > { %s13_s12 = sadd.s32 1, %s1053_s12  }
 0x1a9   : > { %p10_p4 = scmp.ge.s32.totalorder %s13_s12, 6  }
 0x1ab   :  { %12 = sbr.rel (!%p10_p4) target bundleno = 1 (0x1), region = 68 }

</bundles_post_ra>
